<compile_context>
chip_gen: v5e
topology: v5e:2x2
jax: 0.10.0
libtpu: 0.0.40
codegen_flags: <defaults>
</compile_context>

<pallas_src>
import jax
import jax.numpy as jnp
from jax.experimental import pallas as pl
from jax.experimental.pallas import tpu as pltpu

_LANE = 128          # vreg lane width
_MAX_LANE = 4096     # cap on lane-dense last dim when re-slabbing ragged inputs


def _linreg_kernel(w_ref, b_ref, x_ref, o_ref):
    # w_ref / b_ref: (1,)-shaped scalars in SMEM; x_ref / o_ref: VMEM tiles.
    w = w_ref[0]
    b = b_ref[0]
    # Compute in the promoted (f32) precision, store with an explicit cast.
    o_ref[...] = (w * x_ref[...] + b).astype(o_ref.dtype)


def _sublane_for(dtype):
    """Sublane alignment for packed dtypes: f32->8, bf16->16, int8/fp8->32."""
    bits = jnp.dtype(dtype).itemsize * 8
    return max(8, 256 // max(bits, 1))


def _chip_profile():
    """(two_tensorcores, target_block_bytes) for the local TPU generation."""
    try:
        kind = jax.devices()[0].device_kind.lower()
    except Exception:  # pragma: no cover - defensive
        kind = ""
    two_tc = ("v7" in kind) or ("7x" in kind)          # v7x: 2 TCs per chip
    target_block_bytes = (8 << 20) if two_tc else (4 << 20)
    return two_tc, target_block_bytes


def _as_lane_dense_2d(x, sublane):
    """Zero-copy view of x as (rows, lane): lane % 128 == 0, rows % sublane == 0.

    Returns None when no such free reshape exists (ragged path handles it)."""
    n = x.size
    if x.ndim >= 2 and x.shape[-1] % _LANE == 0:
        last = x.shape[-1]
        rows = n // last
        if rows > 0 and rows % sublane == 0:
            return x.reshape(rows, last)
    lane = _MAX_LANE
    while lane >= _LANE:
        if n % (lane * sublane) == 0:
            return x.reshape(n // lane, lane)
        lane //= 2
    return None


def _ragged_to_2d(x, sublane):
    """Flatten + pad only to one (sublane, lane) tile-group boundary."""
    n = x.size
    lane = _LANE
    while lane * 2 <= _MAX_LANE and n >= lane * 2 * sublane:
        lane *= 2
    rows = pl.cdiv(n, lane)
    rows = pl.cdiv(rows, sublane) * sublane
    n_pad = rows * lane
    x_flat = x.reshape(-1)
    if n_pad != n:
        x_flat = jnp.pad(x_flat, (0, n_pad - n))
    return x_flat.reshape(rows, lane), n_pad


def _choose_block_rows(rows, lane, itemsize, sublane, two_tc, target_block_bytes):
    """Block row count: sublane-aligned, ~target bytes, even >=2 grid on 2-TC chips."""
    groups = rows // sublane                       # (sublane, lane) row-groups
    bytes_per_group = lane * sublane * itemsize
    max_groups_per_block = max(1, target_block_bytes // bytes_per_group)
    n_blocks = pl.cdiv(groups, max_groups_per_block)
    if two_tc and groups >= 2:
        # >= 2 blocks and an even count so both TensorCores get balanced streams.
        n_blocks = max(n_blocks, 2)
        if n_blocks % 2:
            n_blocks += 1
        n_blocks = min(n_blocks, groups)
    block_groups = max(1, pl.cdiv(groups, n_blocks))
    return block_groups * sublane


def linear_regression_forward(x, w, b, *, donate_x=False):
    """y = w * x + b elementwise over x (any shape); w, b: (1,) f32 arrays."""
    orig_shape = x.shape
    n = x.size
    if n == 0:
        return (w[0] * x + b[0]).astype(x.dtype)

    itemsize = jnp.dtype(x.dtype).itemsize
    sublane = _sublane_for(x.dtype)
    two_tc, target_block_bytes = _chip_profile()

    x2d = _as_lane_dense_2d(x, sublane)
    aligned = x2d is not None
    if aligned:
        n_pad = n
    else:
        x2d, n_pad = _ragged_to_2d(x, sublane)

    rows, lane = x2d.shape
    block_rows = _choose_block_rows(rows, lane, itemsize, sublane, two_tc,
                                    target_block_bytes)
    grid = (pl.cdiv(rows, block_rows),)            # trailing partial block is masked

    block_bytes = block_rows * lane * itemsize
    # Double-buffered input + output blocks, plus headroom; never below the 32 MiB
    # scoped default, never above v7x's 64 MiB physical VMEM.
    vmem_limit = min(max(4 * block_bytes + (4 << 20), 32 << 20), 64 << 20)

    extra_kwargs = {}
    if donate_x and aligned:
        # Output reuses x's HBM buffer when the caller donates x (no extra alloc).
        extra_kwargs["input_output_aliases"] = {2: 0}

    y2d = pl.pallas_call(
        _linreg_kernel,
        out_shape=jax.ShapeDtypeStruct((rows, lane), x.dtype),
        grid_spec=pltpu.PrefetchScalarGridSpec(
            num_scalar_prefetch=0,
            grid=grid,
            in_specs=[
                pl.BlockSpec(memory_space=pltpu.MemorySpace.SMEM),  # w (1,)
                pl.BlockSpec(memory_space=pltpu.MemorySpace.SMEM),  # b (1,)
                pl.BlockSpec((block_rows, lane), lambda i: (i, 0)),
            ],
            out_specs=pl.BlockSpec((block_rows, lane), lambda i: (i, 0)),
        ),
        compiler_params=pltpu.CompilerParams(
            dimension_semantics=("parallel",),
            vmem_limit_bytes=vmem_limit,
        ),
        cost_estimate=pl.CostEstimate(
            flops=2 * n_pad,
            transcendentals=0,
            bytes_accessed=2 * n_pad * itemsize,
        ),
        **extra_kwargs,
    )(w, b, x2d)

    if aligned:
        return y2d.reshape(orig_shape)
    # Ragged path: tiny (< one tile-group) pad is sliced off.
    return y2d.reshape(-1)[:n].reshape(orig_shape)


if __name__ == "__main__":
    key = jax.random.PRNGKey(0)
    kx, kw, kb, kx2, kx3 = jax.random.split(key, 5)

    # Deterministic "parameters" matching nn.Parameter(torch.rand(1)) shapes.
    w = jax.random.uniform(kw, (1,), dtype=jnp.float32)
    b = jax.random.uniform(kb, (1,), dtype=jnp.float32)

    # Aligned fast path (zero-copy reshape, no pad, no slice).
    x = jax.random.normal(kx, (8, 128), dtype=jnp.float32)
    y = jax.block_until_ready(linear_regression_forward(x, w, b))
    y_ref = w[0] * x + b[0]
    assert jnp.allclose(y, y_ref, atol=1e-6, rtol=1e-6), "mismatch (aligned f32)"

    # Ragged input: exercises the minimal-pad + masked trailing block path.
    x2 = jax.random.normal(kx2, (3, 5, 7), dtype=jnp.float32)
    y2 = jax.block_until_ready(linear_regression_forward(x2, w, b))
    y2_ref = w[0] * x2 + b[0]
    assert jnp.allclose(y2, y2_ref, atol=1e-6, rtol=1e-6), "mismatch (ragged f32)"

    # bf16 input: exercises dtype-aware (16, 128) sublane alignment + explicit cast.
    x3 = jax.random.normal(kx3, (16, 256), dtype=jnp.bfloat16)
    y3 = jax.block_until_ready(linear_regression_forward(x3, w, b))
    y3_ref = (w[0] * x3.astype(jnp.float32) + b[0]).astype(jnp.bfloat16)
    assert jnp.allclose(y3.astype(jnp.float32), y3_ref.astype(jnp.float32),
                        atol=2e-2, rtol=2e-2), "mismatch (aligned bf16)"

    print("KERNEL_OK")
</pallas_src>

<mosaic_0001>
module attributes {stable_mosaic.version = 11 : i64} {
  func.func @_linreg_kernel(%arg0: i32, %arg1: memref<1xf32, #tpu.memory_space<smem>>, %arg2: memref<1xf32, #tpu.memory_space<smem>>, %arg3: memref<8x128xf32, #tpu.memory_space<vmem>>, %arg4: memref<8x128xf32, #tpu.memory_space<vmem>>) attributes {dimension_semantics = [#tpu.dimension_semantics<parallel>], iteration_bounds = array<i64: 1>, scalar_prefetch = 0 : i64, scratch_operands = 0 : i64, tpu.core_type = #tpu.core_type<tc>, window_params = [{transform_indices = @transform_0, window_bounds = array<i64: 1>}, {transform_indices = @transform_1, window_bounds = array<i64: 1>}, {transform_indices = @transform_2, window_bounds = array<i64: 8, 128>}, {transform_indices = @transform_3, window_bounds = array<i64: 8, 128>}]} {
    %c0 = arith.constant 0 : index
    %0 = memref.load %arg1[%c0] : memref<1xf32, #tpu.memory_space<smem>>
    %c0_0 = arith.constant 0 : index
    %1 = memref.load %arg2[%c0_0] : memref<1xf32, #tpu.memory_space<smem>>
    %c0_1 = arith.constant 0 : index
    %c0_2 = arith.constant 0 : index
    %2 = vector.load %arg3[%c0_1, %c0_2] : memref<8x128xf32, #tpu.memory_space<vmem>>, vector<8x128xf32>
    %3 = vector.broadcast %0 : f32 to vector<8x128xf32>
    %4 = arith.mulf %3, %2 : vector<8x128xf32>
    %5 = vector.broadcast %1 : f32 to vector<8x128xf32>
    %6 = arith.addf %4, %5 : vector<8x128xf32>
    %c0_3 = arith.constant 0 : index
    %c0_4 = arith.constant 0 : index
    %7 = vector.load %arg4[%c0_3, %c0_4] : memref<8x128xf32, #tpu.memory_space<vmem>>, vector<8x128xf32>
    tpu.vector_store %arg4[%c0_3, %c0_4], %6 {strides = array<i32>} : memref<8x128xf32, #tpu.memory_space<vmem>>, vector<8x128xf32>,
    return
  }
  func.func @transform_0(%arg0: i32) -> i32 {
    %c0_i32 = arith.constant 0 : i32
    %c0_i32_0 = arith.constant 0 : i32
    return %c0_i32 : i32
  }
  func.func @transform_1(%arg0: i32) -> i32 {
    %c0_i32 = arith.constant 0 : i32
    %c0_i32_0 = arith.constant 0 : i32
    return %c0_i32 : i32
  }
  func.func @transform_2(%arg0: i32) -> (i32, i32) {
    %c0_i32 = arith.constant 0 : i32
    %c0_i32_0 = arith.constant 0 : i32
    return %arg0, %c0_i32 : i32, i32
  }
  func.func @transform_3(%arg0: i32) -> (i32, i32) {
    %c0_i32 = arith.constant 0 : i32
    %c0_i32_0 = arith.constant 0 : i32
    return %arg0, %c0_i32 : i32, i32
  }
}

</mosaic_0001>

<bundles_post_ra>
// kernel: tpu_custom_call.1
= control target key start
LH: loop header
LB: loop body
LE: loop exit
PB: predicated region body
PF: predicated region fallthrough
CT: control target
= control target key end

     0   :  { %10 = vsyncpa [#allocation5], 0  ;;  %s144_s0 = inlined_call_operand.<no memory space> [shape: f32[1], index: 0, kind: input, shape index: {}]   ;;  %s145_s1 = inlined_call_operand.<no memory space> [shape: f32[1], index: 1, kind: input, shape index: {}]   ;;  %s146_s2 = inlined_call_operand.hbm [shape: f32[8,128], index: 2, kind: input, shape index: {}]   ;;  %s147_s3 = inlined_call_operand.hbm [shape: f32[8,128], index: 3, kind: output, shape index: {}]  }
   0x1   :  { %11 = vsyncpa [#allocation6], 0  ;;  %s21_s14 = sshll.u32 %s146_s2, 4  ;;  %s110_s15 = smov [#allocation4]   ;;  %s22_s14 = int_to_ptr.hbm [resolvable:$true] %s21_s14 }
   0x2   :  { %s23_s16 = sshll.u32 %s110_s15, 4  ;;  %s24_s16 = int_to_ptr.vmem [resolvable:$true] %s23_s16 }
   0x3   :  { %26 = dma.hbm_to_vmem [thread:$0]  %s22_s14, 128, %s24_s16, [#allocation5]  }
   0x4   :  { %106 = dma.done.wait [#allocation5], 128  }
   0x5   :  { %107 = vsyncadd [#allocation5], 4294967168  ;;  %v34_v0 = vstv %s144_s0  ;;  %v33_v1 = vld [vmem:[#allocation4] sm:$0xff]  ;;  %v36_v2 = vstv %s145_s1  ;;  %s111_s21 = smov [#allocation7]   ;;  %s46_s24 = sshll.u32 %s147_s3, 4  ;;  %s47_s24 = int_to_ptr.hbm [resolvable:$true] %s46_s24 }
   0x6   :  { %s44_s22 = sshll.u32 %s111_s21, 4  ;;  %v35_v3 = vmul.f32 %v34_v0, %v33_v1  ;;  %s45_s22 = int_to_ptr.vmem [resolvable:$true] %s44_s22 }
   0x8   :  { %v37_v4 = vadd.f32 %v36_v2, %v35_v3 }
   0xa   :  { %38 = vst [vmem:[#allocation7] sm:$0xff] %v37_v4 }
   0xb   :  { %49 = dma.vmem_to_hbm [thread:$0]  %s45_s22, 128, %s47_s24, [#allocation6]  }
   0xc   :  { %108 = dma.done.wait [#allocation6], 128  }
   0xd   :  { %109 = vsyncadd [#allocation6], 4294967168 }
   0xe   :  { %54 = vsyncpa [#allocation5], 1 }
   0xf   :  { %55 = vsyncpa [#allocation6], 1 }

</bundles_post_ra>
